<compile_context>
chip_gen: v7x
topology: tpu7x:2x2x1
jax: 0.10.0
libtpu: 0.0.40
codegen_flags: <defaults>
</compile_context>

<pallas_src>
import functools
import math

import jax
import jax.numpy as jnp
from jax.experimental import pallas as pl
from jax.experimental.pallas import tpu as pltpu

# ----------------------------- model config ---------------------------------
D_MODEL = 32
NUM_HEADS = 4
DFF = 64
HEAD_DIM = D_MODEL // NUM_HEADS
LN_EPS = 1e-5          # PyTorch nn.LayerNorm default
VEC_W = 128            # lane width of the packed small-vector tile


def _layer_norm(t, gamma, beta):
    # two-pass (centered) variance: numerically safe
    mu = jnp.mean(t, axis=-1, keepdims=True)
    c = t - mu
    var = jnp.mean(c * c, axis=-1, keepdims=True)
    return c * jax.lax.rsqrt(var + LN_EPS) * gamma + beta


# ------------------------------ the kernel ----------------------------------
def _make_kernel(*, use_mask):
    def kernel(*refs):
        if use_mask:
            (x_ref, mask_ref, wqkv_ref, wo_ref, w1_ref, w2_ref,
             vec_ref, out_ref) = refs
        else:
            (x_ref, wqkv_ref, wo_ref, w1_ref, w2_ref,
             vec_ref, out_ref) = refs
            mask_ref = None

        R, D = x_ref.shape
        x = x_ref[...]                              # f32 activations
        x_bf = x.astype(jnp.bfloat16)

        # hoist params: each ref read exactly once
        wqkv = wqkv_ref[...]                        # (D, 3D)   bf16, Q pre-scaled
        wo = wo_ref[...]                            # (H, dh, D) bf16
        w1 = w1_ref[...]                            # (D, DFF)  bf16
        w2 = w2_ref[...]                            # (DFF, D)  bf16
        vecs = vec_ref[...]                         # (8, 128)  f32 packed vectors

        bqkv = vecs[0:1, 0:3 * D]
        bo = vecs[1:2, 0:D]
        g1 = vecs[2:3, 0:D]
        be1 = vecs[3:4, 0:D]
        b1 = vecs[4:5, 0:DFF]
        b2 = vecs[5:6, 0:D]
        g2 = vecs[6:7, 0:D]
        be2 = vecs[7:8, 0:D]

        mask = mask_ref[...] if use_mask else None  # (R, R) additive 0 / -1e30

        # -------- fused QKV projection: one (R,D)@(D,3D) MXU push ------------
        qkv = jnp.dot(x_bf, wqkv, preferred_element_type=jnp.float32) + bqkv
        q_bf = qkv[:, 0:D].astype(jnp.bfloat16)         # already * rsqrt(dh)
        k_bf = qkv[:, D:2 * D].astype(jnp.bfloat16)
        v_bf = qkv[:, 2 * D:3 * D].astype(jnp.bfloat16)

        attn = None
        for h in range(NUM_HEADS):                      # static unroll over heads
            lo = h * HEAD_DIM
            # NOTE: 8-lane head slices force small relayouts; acceptable at D=32.
            qh = q_bf[:, lo:lo + HEAD_DIM]
            kh = k_bf[:, lo:lo + HEAD_DIM]
            vh = v_bf[:, lo:lo + HEAD_DIM]

            # scores = qh @ kh^T (contract head dim of both; no explicit transpose)
            s = jax.lax.dot_general(qh, kh, (((1,), (1,)), ((), ())),
                                    preferred_element_type=jnp.float32)
            if mask is not None:
                s = s + mask
            m = jnp.max(s, axis=-1, keepdims=True)
            p = jnp.exp(s - m)                          # unnormalized probabilities
            l = jnp.sum(p, axis=-1, keepdims=True)      # (R, 1)

            head = jnp.dot(p.astype(jnp.bfloat16), vh,
                           preferred_element_type=jnp.float32)
            # normalize the small (R, dh) output, not the (R, R) matrix
            head = head * pl.reciprocal(l, approx=True)
            # fold this head straight into the output projection (no concat);
            # wo[h] is a static leading-dim index (free, no sublane slice)
            contrib = jnp.dot(head.astype(jnp.bfloat16), wo[h],
                              preferred_element_type=jnp.float32)
            attn = contrib if attn is None else attn + contrib
        attn = attn + bo

        # residual + LayerNorm 1
        y = _layer_norm(x + attn, g1, be1)

        # ------------------------------ feed-forward -------------------------
        h1 = jnp.dot(y.astype(jnp.bfloat16), w1,
                     preferred_element_type=jnp.float32) + b1
        h1 = jnp.maximum(h1, 0.0)                       # ReLU
        h2 = jnp.dot(h1.astype(jnp.bfloat16), w2,
                     preferred_element_type=jnp.float32) + b2

        # residual + LayerNorm 2
        z = _layer_norm(y + h2, g2, be2)
        out_ref[...] = z.astype(out_ref.dtype)

    return kernel


# ------------------------------ the wrapper ----------------------------------
def _pick_block_batch(batch, seq, target_rows=256):
    """Largest divisor Bt of `batch` with Bt*seq <= target_rows, preferring a
    grid of >= 2 steps (software pipelining + both TensorCores on v7x)."""
    candidates = [d for d in range(1, batch + 1)
                  if batch % d == 0 and d * seq <= target_rows]
    if not candidates:
        return 1
    multi = [d for d in candidates if batch // d >= 2]
    pool = multi if multi else candidates
    return max(pool)


def encoder_layer(x, kernel_params, *, block_batch=None, target_rows=256):
    """x: (B, S, D) float32; kernel_params: output of pack_params()."""
    wqkv, wo_split, w1, w2, vecs = kernel_params
    B, S, D = x.shape
    if block_batch is None:
        block_batch = _pick_block_batch(B, S, target_rows)
    assert B % block_batch == 0
    rows = block_batch * S
    assert rows % 8 == 0 or rows == B * S, "row slab must be sublane-aligned"

    x2 = x.reshape(B * S, D)             # 2-D kernel I/O, no size-1 block dim
    use_mask = block_batch > 1           # single batch element per slab: no mask

    in_specs = [pl.BlockSpec((rows, D), lambda i: (i, 0))]
    inputs = [x2]

    if use_mask:
        # precomputed additive block-diagonal mask: 0 within a batch element,
        # -1e30 across elements; resident in VMEM (constant block index)
        ri = jnp.arange(rows, dtype=jnp.int32) // S
        mask = jnp.where(ri[:, None] == ri[None, :], 0.0, -1e30)
        mask = mask.astype(jnp.float32)
        in_specs.append(pl.BlockSpec((rows, rows), lambda i: (0, 0)))
        inputs.append(mask)

    # parameters: full (untiled) blocks, constant block index (DMA'd once)
    for p in (wqkv, wo_split, w1, w2, vecs):
        nd = p.ndim
        in_specs.append(pl.BlockSpec(p.shape, lambda i, _nd=nd: (0,) * _nd))
        inputs.append(p)

    out = pl.pallas_call(
        _make_kernel(use_mask=use_mask),
        out_shape=jax.ShapeDtypeStruct((B * S, D), x.dtype),
        grid_spec=pltpu.PrefetchScalarGridSpec(
            num_scalar_prefetch=0,
            grid=(B // block_batch,),
            in_specs=in_specs,
            out_specs=pl.BlockSpec((rows, D), lambda i: (i, 0)),
        ),
        compiler_params=pltpu.CompilerParams(
            dimension_semantics=("parallel",)),
    )(*inputs)
    return out.reshape(B, S, D)


# ------------------------- deterministic param init --------------------------
def init_params(key):
    """Logical (PyTorch-like) parameters, all f32."""
    ks = jax.random.split(key, 8)
    w = lambda k, s: (0.02 * jax.random.normal(k, s)).astype(jnp.float32)
    wq = w(ks[0], (D_MODEL, D_MODEL)); bq = jnp.zeros((1, D_MODEL), jnp.float32)
    wk = w(ks[1], (D_MODEL, D_MODEL)); bk = jnp.zeros((1, D_MODEL), jnp.float32)
    wv = w(ks[2], (D_MODEL, D_MODEL)); bv = jnp.zeros((1, D_MODEL), jnp.float32)
    wo = w(ks[3], (D_MODEL, D_MODEL)); bo = jnp.zeros((1, D_MODEL), jnp.float32)
    g1 = jnp.ones((1, D_MODEL), jnp.float32); be1 = jnp.zeros((1, D_MODEL), jnp.float32)
    w1 = w(ks[4], (D_MODEL, DFF));    b1 = w(ks[5], (1, DFF))
    w2 = w(ks[6], (DFF, D_MODEL));    b2 = w(ks[7], (1, D_MODEL))
    g2 = jnp.ones((1, D_MODEL), jnp.float32); be2 = jnp.zeros((1, D_MODEL), jnp.float32)
    return [wq, bq, wk, bk, wv, bv, wo, bo, g1, be1, w1, b1, w2, b2, g2, be2]


def pack_params(params):
    """Fuse QKV (scale folded into Q), pre-split Wo per head, pack all small
    bias / affine vectors into one (8,128) f32 tile, bf16 matmul weights."""
    (wq, bq, wk, bk, wv, bv, wo, bo, g1, be1,
     w1, b1, w2, b2, g2, be2) = params
    scale = 1.0 / math.sqrt(HEAD_DIM)
    wqkv = jnp.concatenate([wq * scale, wk, wv], axis=1).astype(jnp.bfloat16)
    bqkv = jnp.concatenate([bq * scale, bk, bv], axis=1)          # (1, 3D) f32
    wo_split = wo.reshape(NUM_HEADS, HEAD_DIM, D_MODEL).astype(jnp.bfloat16)

    assert 3 * D_MODEL <= VEC_W and DFF <= VEC_W and D_MODEL <= VEC_W
    vecs = jnp.zeros((8, VEC_W), jnp.float32)

    def put(arr, row, v):
        v = v.reshape(-1)
        return arr.at[row, :v.shape[0]].set(v)

    vecs = put(vecs, 0, bqkv)
    vecs = put(vecs, 1, bo)
    vecs = put(vecs, 2, g1)
    vecs = put(vecs, 3, be1)
    vecs = put(vecs, 4, b1)
    vecs = put(vecs, 5, b2)
    vecs = put(vecs, 6, g2)
    vecs = put(vecs, 7, be2)

    return [wqkv, wo_split,
            w1.astype(jnp.bfloat16), w2.astype(jnp.bfloat16), vecs]


# --------------------------- pure-JAX reference -------------------------------
def encoder_layer_ref(x, params):
    (wq, bq, wk, bk, wv, bv, wo, bo, g1, be1,
     w1, b1, w2, b2, g2, be2) = params
    q = x @ wq + bq
    k = x @ wk + bk
    v = x @ wv + bv
    B, S, D = x.shape
    qh = q.reshape(B, S, NUM_HEADS, HEAD_DIM).transpose(0, 2, 1, 3)
    kh = k.reshape(B, S, NUM_HEADS, HEAD_DIM).transpose(0, 2, 1, 3)
    vh = v.reshape(B, S, NUM_HEADS, HEAD_DIM).transpose(0, 2, 1, 3)
    scores = jnp.einsum("bhqd,bhkd->bhqk", qh, kh) / math.sqrt(HEAD_DIM)
    p = jax.nn.softmax(scores, axis=-1)
    o = jnp.einsum("bhqk,bhkd->bhqd", p, vh).transpose(0, 2, 1, 3).reshape(B, S, D)
    attn = o @ wo + bo

    def ln(t, g, b):
        mu = jnp.mean(t, axis=-1, keepdims=True)
        var = jnp.mean((t - mu) ** 2, axis=-1, keepdims=True)
        return (t - mu) * jax.lax.rsqrt(var + LN_EPS) * g + b

    y = ln(x + attn, g1, be1)
    h = jnp.maximum(y @ w1 + b1, 0.0)
    z = ln(y + (h @ w2 + b2), g2, be2)
    return z


# ---------------------------------- main --------------------------------------
if __name__ == "__main__":
    key = jax.random.PRNGKey(0)
    k_x, k_p, k_x2 = jax.random.split(key, 3)

    params = init_params(k_p)
    kparams = pack_params(params)

    # test 1: tiny shape -> one batch element per slab (no mask), grid = 2
    B, S = 2, 8
    x = jax.random.normal(k_x, (B, S, D_MODEL), dtype=jnp.float32)
    out = jax.block_until_ready(encoder_layer(x, kparams))
    ref = encoder_layer_ref(x, params)
    assert out.shape == (B, S, D_MODEL)
    # bf16 MXU operands (f32 accumulation) -> slightly looser tolerance
    assert jnp.allclose(out, ref, rtol=2e-2, atol=2e-2), "mismatch vs reference (no-mask path)"

    # test 2: multi-batch row slab -> exercises the additive block-diagonal mask
    B2, S2 = 8, 8
    x2 = jax.random.normal(k_x2, (B2, S2, D_MODEL), dtype=jnp.float32)
    out2 = jax.block_until_ready(encoder_layer(x2, kparams, target_rows=32))
    ref2 = encoder_layer_ref(x2, params)
    assert jnp.allclose(out2, ref2, rtol=2e-2, atol=2e-2), "mismatch vs reference (mask path)"

    print("KERNEL_OK")
</pallas_src>

<mosaic_0001>
module attributes {stable_mosaic.version = 11 : i64} {
  func.func @kernel(%arg0: i32, %arg1: memref<8x32xf32, #tpu.memory_space<vmem>>, %arg2: memref<32x96xbf16, #tpu.memory_space<vmem>>, %arg3: memref<4x8x32xbf16, #tpu.memory_space<vmem>>, %arg4: memref<32x64xbf16, #tpu.memory_space<vmem>>, %arg5: memref<64x32xbf16, #tpu.memory_space<vmem>>, %arg6: memref<8x128xf32, #tpu.memory_space<vmem>>, %arg7: memref<8x32xf32, #tpu.memory_space<vmem>>) attributes {dimension_semantics = [#tpu.dimension_semantics<parallel>], iteration_bounds = array<i64: 2>, scalar_prefetch = 0 : i64, scratch_operands = 0 : i64, tpu.core_type = #tpu.core_type<tc>, window_params = [{transform_indices = @transform_0, window_bounds = array<i64: 8, 32>}, {pipeline_mode = #tpu.pipeline_mode<synchronous>, transform_indices = @transform_1, window_bounds = array<i64: 32, 96>}, {pipeline_mode = #tpu.pipeline_mode<synchronous>, transform_indices = @transform_2, window_bounds = array<i64: 4, 8, 32>}, {pipeline_mode = #tpu.pipeline_mode<synchronous>, transform_indices = @transform_3, window_bounds = array<i64: 32, 64>}, {pipeline_mode = #tpu.pipeline_mode<synchronous>, transform_indices = @transform_4, window_bounds = array<i64: 64, 32>}, {pipeline_mode = #tpu.pipeline_mode<synchronous>, transform_indices = @transform_5, window_bounds = array<i64: 8, 128>}, {transform_indices = @transform_6, window_bounds = array<i64: 8, 32>}]} {
    %c0 = arith.constant 0 : index
    %c0_0 = arith.constant 0 : index
    %0 = vector.load %arg1[%c0, %c0_0] : memref<8x32xf32, #tpu.memory_space<vmem>>, vector<8x32xf32>
    %1 = arith.truncf %0 : vector<8x32xf32> to vector<8x32xbf16>
    %c0_1 = arith.constant 0 : index
    %c0_2 = arith.constant 0 : index
    %2 = vector.load %arg2[%c0_1, %c0_2] : memref<32x96xbf16, #tpu.memory_space<vmem>>, vector<32x96xbf16>
    %c0_3 = arith.constant 0 : index
    %c0_4 = arith.constant 0 : index
    %c0_5 = arith.constant 0 : index
    %3 = vector.load %arg3[%c0_3, %c0_4, %c0_5] : memref<4x8x32xbf16, #tpu.memory_space<vmem>>, vector<4x8x32xbf16>
    %c0_6 = arith.constant 0 : index
    %c0_7 = arith.constant 0 : index
    %4 = vector.load %arg4[%c0_6, %c0_7] : memref<32x64xbf16, #tpu.memory_space<vmem>>, vector<32x64xbf16>
    %c0_8 = arith.constant 0 : index
    %c0_9 = arith.constant 0 : index
    %5 = vector.load %arg5[%c0_8, %c0_9] : memref<64x32xbf16, #tpu.memory_space<vmem>>, vector<64x32xbf16>
    %c0_10 = arith.constant 0 : index
    %c0_11 = arith.constant 0 : index
    %6 = vector.load %arg6[%c0_10, %c0_11] : memref<8x128xf32, #tpu.memory_space<vmem>>, vector<8x128xf32>
    %7 = vector.extract_strided_slice %6 {offsets = [0, 0], sizes = [1, 96], strides = [1, 1]} : vector<8x128xf32> to vector<1x96xf32>
    %8 = vector.extract_strided_slice %6 {offsets = [1, 0], sizes = [1, 32], strides = [1, 1]} : vector<8x128xf32> to vector<1x32xf32>
    %9 = vector.extract_strided_slice %6 {offsets = [2, 0], sizes = [1, 32], strides = [1, 1]} : vector<8x128xf32> to vector<1x32xf32>
    %10 = vector.extract_strided_slice %6 {offsets = [3, 0], sizes = [1, 32], strides = [1, 1]} : vector<8x128xf32> to vector<1x32xf32>
    %11 = vector.extract_strided_slice %6 {offsets = [4, 0], sizes = [1, 64], strides = [1, 1]} : vector<8x128xf32> to vector<1x64xf32>
    %12 = vector.extract_strided_slice %6 {offsets = [5, 0], sizes = [1, 32], strides = [1, 1]} : vector<8x128xf32> to vector<1x32xf32>
    %13 = vector.extract_strided_slice %6 {offsets = [6, 0], sizes = [1, 32], strides = [1, 1]} : vector<8x128xf32> to vector<1x32xf32>
    %14 = vector.extract_strided_slice %6 {offsets = [7, 0], sizes = [1, 32], strides = [1, 1]} : vector<8x128xf32> to vector<1x32xf32>
    %cst = arith.constant dense<0.000000e+00> : vector<8x96xf32>
    %15 = tpu.matmul %1, %2, %cst {dimension_numbers = #tpu.dot_dimension_numbers<[1], [0], [0], [1], [0, 0, 1, 1], [], []>} : vector<8x32xbf16>, vector<32x96xbf16>, vector<8x96xf32> -> vector<8x96xf32>
    %16 = vector.broadcast %7 : vector<1x96xf32> to vector<8x96xf32>
    %17 = arith.addf %15, %16 : vector<8x96xf32>
    %18 = vector.extract_strided_slice %17 {offsets = [0, 0], sizes = [8, 32], strides = [1, 1]} : vector<8x96xf32> to vector<8x32xf32>
    %19 = arith.truncf %18 : vector<8x32xf32> to vector<8x32xbf16>
    %20 = vector.extract_strided_slice %17 {offsets = [0, 32], sizes = [8, 32], strides = [1, 1]} : vector<8x96xf32> to vector<8x32xf32>
    %21 = arith.truncf %20 : vector<8x32xf32> to vector<8x32xbf16>
    %22 = vector.extract_strided_slice %17 {offsets = [0, 64], sizes = [8, 32], strides = [1, 1]} : vector<8x96xf32> to vector<8x32xf32>
    %23 = arith.truncf %22 : vector<8x32xf32> to vector<8x32xbf16>
    %24 = vector.extract_strided_slice %19 {offsets = [0, 0], sizes = [8, 8], strides = [1, 1]} : vector<8x32xbf16> to vector<8x8xbf16>
    %25 = vector.extract_strided_slice %21 {offsets = [0, 0], sizes = [8, 8], strides = [1, 1]} : vector<8x32xbf16> to vector<8x8xbf16>
    %26 = vector.extract_strided_slice %23 {offsets = [0, 0], sizes = [8, 8], strides = [1, 1]} : vector<8x32xbf16> to vector<8x8xbf16>
    %cst_12 = arith.constant dense<0.000000e+00> : vector<8x8xf32>
    %27 = tpu.matmul %24, %25, %cst_12 {dimension_numbers = #tpu.dot_dimension_numbers<[1], [1], [0], [0], [0, 0, 1, 0], [], []>} : vector<8x8xbf16>, vector<8x8xbf16>, vector<8x8xf32> -> vector<8x8xf32>
    %cst_13 = arith.constant dense<0xFF800000> : vector<8xf32>
    %28 = vector.multi_reduction <maximumf>, %27, %cst_13 [1] : vector<8x8xf32> to vector<8xf32>
    %29 = vector.shape_cast %28 : vector<8xf32> to vector<8x1xf32>
    %30 = vector.broadcast %29 : vector<8x1xf32> to vector<8x8xf32>
    %31 = arith.subf %27, %30 : vector<8x8xf32>
    %32 = math.exp %31 : vector<8x8xf32>
    %cst_14 = arith.constant dense<0.000000e+00> : vector<8xf32>
    %33 = vector.multi_reduction <add>, %32, %cst_14 [1] : vector<8x8xf32> to vector<8xf32>
    %34 = vector.shape_cast %33 : vector<8xf32> to vector<8x1xf32>
    %35 = arith.truncf %32 : vector<8x8xf32> to vector<8x8xbf16>
    %cst_15 = arith.constant dense<0.000000e+00> : vector<8x8xf32>
    %36 = tpu.matmul %35, %26, %cst_15 {dimension_numbers = #tpu.dot_dimension_numbers<[1], [0], [0], [1], [0, 0, 1, 1], [], []>} : vector<8x8xbf16>, vector<8x8xbf16>, vector<8x8xf32> -> vector<8x8xf32>
    %37 = tpu.reciprocal %34 {approx = true} : vector<8x1xf32> -> vector<8x1xf32>
    %38 = vector.broadcast %37 : vector<8x1xf32> to vector<8x8xf32>
    %39 = arith.mulf %36, %38 : vector<8x8xf32>
    %40 = arith.truncf %39 : vector<8x8xf32> to vector<8x8xbf16>
    %41 = vector.extract_strided_slice %3 {offsets = [0, 0, 0], sizes = [1, 8, 32], strides = [1, 1, 1]} : vector<4x8x32xbf16> to vector<1x8x32xbf16>
    %42 = vector.shape_cast %41 : vector<1x8x32xbf16> to vector<8x32xbf16>
    %cst_16 = arith.constant dense<0.000000e+00> : vector<8x32xf32>
    %43 = tpu.matmul %40, %42, %cst_16 {dimension_numbers = #tpu.dot_dimension_numbers<[1], [0], [0], [1], [0, 0, 1, 1], [], []>} : vector<8x8xbf16>, vector<8x32xbf16>, vector<8x32xf32> -> vector<8x32xf32>
    %44 = vector.extract_strided_slice %19 {offsets = [0, 8], sizes = [8, 8], strides = [1, 1]} : vector<8x32xbf16> to vector<8x8xbf16>
    %45 = vector.extract_strided_slice %21 {offsets = [0, 8], sizes = [8, 8], strides = [1, 1]} : vector<8x32xbf16> to vector<8x8xbf16>
    %46 = vector.extract_strided_slice %23 {offsets = [0, 8], sizes = [8, 8], strides = [1, 1]} : vector<8x32xbf16> to vector<8x8xbf16>
    %cst_17 = arith.constant dense<0.000000e+00> : vector<8x8xf32>
    %47 = tpu.matmul %44, %45, %cst_17 {dimension_numbers = #tpu.dot_dimension_numbers<[1], [1], [0], [0], [0, 0, 1, 0], [], []>} : vector<8x8xbf16>, vector<8x8xbf16>, vector<8x8xf32> -> vector<8x8xf32>
    %cst_18 = arith.constant dense<0xFF800000> : vector<8xf32>
    %48 = vector.multi_reduction <maximumf>, %47, %cst_18 [1] : vector<8x8xf32> to vector<8xf32>
    %49 = vector.shape_cast %48 : vector<8xf32> to vector<8x1xf32>
    %50 = vector.broadcast %49 : vector<8x1xf32> to vector<8x8xf32>
    %51 = arith.subf %47, %50 : vector<8x8xf32>
    %52 = math.exp %51 : vector<8x8xf32>
    %cst_19 = arith.constant dense<0.000000e+00> : vector<8xf32>
    %53 = vector.multi_reduction <add>, %52, %cst_19 [1] : vector<8x8xf32> to vector<8xf32>
    %54 = vector.shape_cast %53 : vector<8xf32> to vector<8x1xf32>
    %55 = arith.truncf %52 : vector<8x8xf32> to vector<8x8xbf16>
    %cst_20 = arith.constant dense<0.000000e+00> : vector<8x8xf32>
    %56 = tpu.matmul %55, %46, %cst_20 {dimension_numbers = #tpu.dot_dimension_numbers<[1], [0], [0], [1], [0, 0, 1, 1], [], []>} : vector<8x8xbf16>, vector<8x8xbf16>, vector<8x8xf32> -> vector<8x8xf32>
    %57 = tpu.reciprocal %54 {approx = true} : vector<8x1xf32> -> vector<8x1xf32>
    %58 = vector.broadcast %57 : vector<8x1xf32> to vector<8x8xf32>
    %59 = arith.mulf %56, %58 : vector<8x8xf32>
    %60 = arith.truncf %59 : vector<8x8xf32> to vector<8x8xbf16>
    %61 = vector.extract_strided_slice %3 {offsets = [1, 0, 0], sizes = [1, 8, 32], strides = [1, 1, 1]} : vector<4x8x32xbf16> to vector<1x8x32xbf16>
    %62 = vector.shape_cast %61 : vector<1x8x32xbf16> to vector<8x32xbf16>
    %cst_21 = arith.constant dense<0.000000e+00> : vector<8x32xf32>
    %63 = tpu.matmul %60, %62, %cst_21 {dimension_numbers = #tpu.dot_dimension_numbers<[1], [0], [0], [1], [0, 0, 1, 1], [], []>} : vector<8x8xbf16>, vector<8x32xbf16>, vector<8x32xf32> -> vector<8x32xf32>
    %64 = arith.addf %43, %63 : vector<8x32xf32>
    %65 = vector.extract_strided_slice %19 {offsets = [0, 16], sizes = [8, 8], strides = [1, 1]} : vector<8x32xbf16> to vector<8x8xbf16>
    %66 = vector.extract_strided_slice %21 {offsets = [0, 16], sizes = [8, 8], strides = [1, 1]} : vector<8x32xbf16> to vector<8x8xbf16>
    %67 = vector.extract_strided_slice %23 {offsets = [0, 16], sizes = [8, 8], strides = [1, 1]} : vector<8x32xbf16> to vector<8x8xbf16>
    %cst_22 = arith.constant dense<0.000000e+00> : vector<8x8xf32>
    %68 = tpu.matmul %65, %66, %cst_22 {dimension_numbers = #tpu.dot_dimension_numbers<[1], [1], [0], [0], [0, 0, 1, 0], [], []>} : vector<8x8xbf16>, vector<8x8xbf16>, vector<8x8xf32> -> vector<8x8xf32>
    %cst_23 = arith.constant dense<0xFF800000> : vector<8xf32>
    %69 = vector.multi_reduction <maximumf>, %68, %cst_23 [1] : vector<8x8xf32> to vector<8xf32>
    %70 = vector.shape_cast %69 : vector<8xf32> to vector<8x1xf32>
    %71 = vector.broadcast %70 : vector<8x1xf32> to vector<8x8xf32>
    %72 = arith.subf %68, %71 : vector<8x8xf32>
    %73 = math.exp %72 : vector<8x8xf32>
    %cst_24 = arith.constant dense<0.000000e+00> : vector<8xf32>
    %74 = vector.multi_reduction <add>, %73, %cst_24 [1] : vector<8x8xf32> to vector<8xf32>
    %75 = vector.shape_cast %74 : vector<8xf32> to vector<8x1xf32>
    %76 = arith.truncf %73 : vector<8x8xf32> to vector<8x8xbf16>
    %cst_25 = arith.constant dense<0.000000e+00> : vector<8x8xf32>
    %77 = tpu.matmul %76, %67, %cst_25 {dimension_numbers = #tpu.dot_dimension_numbers<[1], [0], [0], [1], [0, 0, 1, 1], [], []>} : vector<8x8xbf16>, vector<8x8xbf16>, vector<8x8xf32> -> vector<8x8xf32>
    %78 = tpu.reciprocal %75 {approx = true} : vector<8x1xf32> -> vector<8x1xf32>
    %79 = vector.broadcast %78 : vector<8x1xf32> to vector<8x8xf32>
    %80 = arith.mulf %77, %79 : vector<8x8xf32>
    %81 = arith.truncf %80 : vector<8x8xf32> to vector<8x8xbf16>
    %82 = vector.extract_strided_slice %3 {offsets = [2, 0, 0], sizes = [1, 8, 32], strides = [1, 1, 1]} : vector<4x8x32xbf16> to vector<1x8x32xbf16>
    %83 = vector.shape_cast %82 : vector<1x8x32xbf16> to vector<8x32xbf16>
    %cst_26 = arith.constant dense<0.000000e+00> : vector<8x32xf32>
    %84 = tpu.matmul %81, %83, %cst_26 {dimension_numbers = #tpu.dot_dimension_numbers<[1], [0], [0], [1], [0, 0, 1, 1], [], []>} : vector<8x8xbf16>, vector<8x32xbf16>, vector<8x32xf32> -> vector<8x32xf32>
    %85 = arith.addf %64, %84 : vector<8x32xf32>
    %86 = vector.extract_strided_slice %19 {offsets = [0, 24], sizes = [8, 8], strides = [1, 1]} : vector<8x32xbf16> to vector<8x8xbf16>
    %87 = vector.extract_strided_slice %21 {offsets = [0, 24], sizes = [8, 8], strides = [1, 1]} : vector<8x32xbf16> to vector<8x8xbf16>
    %88 = vector.extract_strided_slice %23 {offsets = [0, 24], sizes = [8, 8], strides = [1, 1]} : vector<8x32xbf16> to vector<8x8xbf16>
    %cst_27 = arith.constant dense<0.000000e+00> : vector<8x8xf32>
    %89 = tpu.matmul %86, %87, %cst_27 {dimension_numbers = #tpu.dot_dimension_numbers<[1], [1], [0], [0], [0, 0, 1, 0], [], []>} : vector<8x8xbf16>, vector<8x8xbf16>, vector<8x8xf32> -> vector<8x8xf32>
    %cst_28 = arith.constant dense<0xFF800000> : vector<8xf32>
    %90 = vector.multi_reduction <maximumf>, %89, %cst_28 [1] : vector<8x8xf32> to vector<8xf32>
    %91 = vector.shape_cast %90 : vector<8xf32> to vector<8x1xf32>
    %92 = vector.broadcast %91 : vector<8x1xf32> to vector<8x8xf32>
    %93 = arith.subf %89, %92 : vector<8x8xf32>
    %94 = math.exp %93 : vector<8x8xf32>
    %cst_29 = arith.constant dense<0.000000e+00> : vector<8xf32>
    %95 = vector.multi_reduction <add>, %94, %cst_29 [1] : vector<8x8xf32> to vector<8xf32>
    %96 = vector.shape_cast %95 : vector<8xf32> to vector<8x1xf32>
    %97 = arith.truncf %94 : vector<8x8xf32> to vector<8x8xbf16>
    %cst_30 = arith.constant dense<0.000000e+00> : vector<8x8xf32>
    %98 = tpu.matmul %97, %88, %cst_30 {dimension_numbers = #tpu.dot_dimension_numbers<[1], [0], [0], [1], [0, 0, 1, 1], [], []>} : vector<8x8xbf16>, vector<8x8xbf16>, vector<8x8xf32> -> vector<8x8xf32>
    %99 = tpu.reciprocal %96 {approx = true} : vector<8x1xf32> -> vector<8x1xf32>
    %100 = vector.broadcast %99 : vector<8x1xf32> to vector<8x8xf32>
    %101 = arith.mulf %98, %100 : vector<8x8xf32>
    %102 = arith.truncf %101 : vector<8x8xf32> to vector<8x8xbf16>
    %103 = vector.extract_strided_slice %3 {offsets = [3, 0, 0], sizes = [1, 8, 32], strides = [1, 1, 1]} : vector<4x8x32xbf16> to vector<1x8x32xbf16>
    %104 = vector.shape_cast %103 : vector<1x8x32xbf16> to vector<8x32xbf16>
    %cst_31 = arith.constant dense<0.000000e+00> : vector<8x32xf32>
    %105 = tpu.matmul %102, %104, %cst_31 {dimension_numbers = #tpu.dot_dimension_numbers<[1], [0], [0], [1], [0, 0, 1, 1], [], []>} : vector<8x8xbf16>, vector<8x32xbf16>, vector<8x32xf32> -> vector<8x32xf32>
    %106 = arith.addf %85, %105 : vector<8x32xf32>
    %107 = vector.broadcast %8 : vector<1x32xf32> to vector<8x32xf32>
    %108 = arith.addf %106, %107 : vector<8x32xf32>
    %109 = arith.addf %0, %108 : vector<8x32xf32>
    %cst_32 = arith.constant dense<0.000000e+00> : vector<8xf32>
    %110 = vector.multi_reduction <add>, %109, %cst_32 [1] : vector<8x32xf32> to vector<8xf32>
    %111 = vector.shape_cast %110 : vector<8xf32> to vector<8x1xf32>
    %cst_33 = arith.constant 3.200000e+01 : f32
    %112 = vector.broadcast %cst_33 : f32 to vector<8x1xf32>
    %113 = arith.divf %111, %112 : vector<8x1xf32>
    %114 = vector.broadcast %113 : vector<8x1xf32> to vector<8x32xf32>
    %115 = arith.subf %109, %114 : vector<8x32xf32>
    %116 = arith.mulf %115, %115 : vector<8x32xf32>
    %cst_34 = arith.constant dense<0.000000e+00> : vector<8xf32>
    %117 = vector.multi_reduction <add>, %116, %cst_34 [1] : vector<8x32xf32> to vector<8xf32>
    %118 = vector.shape_cast %117 : vector<8xf32> to vector<8x1xf32>
    %cst_35 = arith.constant 3.200000e+01 : f32
    %119 = vector.broadcast %cst_35 : f32 to vector<8x1xf32>
    %120 = arith.divf %118, %119 : vector<8x1xf32>
    %cst_36 = arith.constant 9.99999974E-6 : f32
    %121 = vector.broadcast %cst_36 : f32 to vector<8x1xf32>
    %122 = arith.addf %120, %121 : vector<8x1xf32>
    %123 = math.rsqrt %122 : vector<8x1xf32>
    %124 = vector.broadcast %123 : vector<8x1xf32> to vector<8x32xf32>
    %125 = arith.mulf %115, %124 : vector<8x32xf32>
    %126 = vector.broadcast %9 : vector<1x32xf32> to vector<8x32xf32>
    %127 = arith.mulf %125, %126 : vector<8x32xf32>
    %128 = vector.broadcast %10 : vector<1x32xf32> to vector<8x32xf32>
    %129 = arith.addf %127, %128 : vector<8x32xf32>
    %130 = arith.truncf %129 : vector<8x32xf32> to vector<8x32xbf16>
    %cst_37 = arith.constant dense<0.000000e+00> : vector<8x64xf32>
    %131 = tpu.matmul %130, %4, %cst_37 {dimension_numbers = #tpu.dot_dimension_numbers<[1], [0], [0], [1], [0, 0, 1, 1], [], []>} : vector<8x32xbf16>, vector<32x64xbf16>, vector<8x64xf32> -> vector<8x64xf32>
    %132 = vector.broadcast %11 : vector<1x64xf32> to vector<8x64xf32>
    %133 = arith.addf %131, %132 : vector<8x64xf32>
    %cst_38 = arith.constant 0.000000e+00 : f32
    %134 = vector.broadcast %cst_38 : f32 to vector<8x64xf32>
    %135 = arith.maximumf %133, %134 : vector<8x64xf32>
    %136 = arith.truncf %135 : vector<8x64xf32> to vector<8x64xbf16>
    %cst_39 = arith.constant dense<0.000000e+00> : vector<8x32xf32>
    %137 = tpu.matmul %136, %5, %cst_39 {dimension_numbers = #tpu.dot_dimension_numbers<[1], [0], [0], [1], [0, 0, 1, 1], [], []>} : vector<8x64xbf16>, vector<64x32xbf16>, vector<8x32xf32> -> vector<8x32xf32>
    %138 = vector.broadcast %12 : vector<1x32xf32> to vector<8x32xf32>
    %139 = arith.addf %137, %138 : vector<8x32xf32>
    %140 = arith.addf %129, %139 : vector<8x32xf32>
    %cst_40 = arith.constant dense<0.000000e+00> : vector<8xf32>
    %141 = vector.multi_reduction <add>, %140, %cst_40 [1] : vector<8x32xf32> to vector<8xf32>
    %142 = vector.shape_cast %141 : vector<8xf32> to vector<8x1xf32>
    %cst_41 = arith.constant 3.200000e+01 : f32
    %143 = vector.broadcast %cst_41 : f32 to vector<8x1xf32>
    %144 = arith.divf %142, %143 : vector<8x1xf32>
    %145 = vector.broadcast %144 : vector<8x1xf32> to vector<8x32xf32>
    %146 = arith.subf %140, %145 : vector<8x32xf32>
    %147 = arith.mulf %146, %146 : vector<8x32xf32>
    %cst_42 = arith.constant dense<0.000000e+00> : vector<8xf32>
    %148 = vector.multi_reduction <add>, %147, %cst_42 [1] : vector<8x32xf32> to vector<8xf32>
    %149 = vector.shape_cast %148 : vector<8xf32> to vector<8x1xf32>
    %cst_43 = arith.constant 3.200000e+01 : f32
    %150 = vector.broadcast %cst_43 : f32 to vector<8x1xf32>
    %151 = arith.divf %149, %150 : vector<8x1xf32>
    %cst_44 = arith.constant 9.99999974E-6 : f32
    %152 = vector.broadcast %cst_44 : f32 to vector<8x1xf32>
    %153 = arith.addf %151, %152 : vector<8x1xf32>
    %154 = math.rsqrt %153 : vector<8x1xf32>
    %155 = vector.broadcast %154 : vector<8x1xf32> to vector<8x32xf32>
    %156 = arith.mulf %146, %155 : vector<8x32xf32>
    %157 = vector.broadcast %13 : vector<1x32xf32> to vector<8x32xf32>
    %158 = arith.mulf %156, %157 : vector<8x32xf32>
    %159 = vector.broadcast %14 : vector<1x32xf32> to vector<8x32xf32>
    %160 = arith.addf %158, %159 : vector<8x32xf32>
    %c0_45 = arith.constant 0 : index
    %c0_46 = arith.constant 0 : index
    %161 = vector.load %arg7[%c0_45, %c0_46] : memref<8x32xf32, #tpu.memory_space<vmem>>, vector<8x32xf32>
    tpu.vector_store %arg7[%c0_45, %c0_46], %160 {strides = array<i32>} : memref<8x32xf32, #tpu.memory_space<vmem>>, vector<8x32xf32>,
    return
  }
  func.func @transform_0(%arg0: i32) -> (i32, i32) {
    %c0_i32 = arith.constant 0 : i32
    %c0_i32_0 = arith.constant 0 : i32
    return %arg0, %c0_i32 : i32, i32
  }
  func.func @transform_1(%arg0: i32) -> (i32, i32) {
    %c0_i32 = arith.constant 0 : i32
    %c0_i32_0 = arith.constant 0 : i32
    %c0_i32_1 = arith.constant 0 : i32
    return %c0_i32, %c0_i32_0 : i32, i32
  }
  func.func @transform_2(%arg0: i32) -> (i32, i32, i32) {
    %c0_i32 = arith.constant 0 : i32
    %c0_i32_0 = arith.constant 0 : i32
    %c0_i32_1 = arith.constant 0 : i32
    %c0_i32_2 = arith.constant 0 : i32
    return %c0_i32, %c0_i32_0, %c0_i32_1 : i32, i32, i32
  }
  func.func @transform_3(%arg0: i32) -> (i32, i32) {
    %c0_i32 = arith.constant 0 : i32
    %c0_i32_0 = arith.constant 0 : i32
    %c0_i32_1 = arith.constant 0 : i32
    return %c0_i32, %c0_i32_0 : i32, i32
  }
  func.func @transform_4(%arg0: i32) -> (i32, i32) {
    %c0_i32 = arith.constant 0 : i32
    %c0_i32_0 = arith.constant 0 : i32
    %c0_i32_1 = arith.constant 0 : i32
    return %c0_i32, %c0_i32_0 : i32, i32
  }
  func.func @transform_5(%arg0: i32) -> (i32, i32) {
    %c0_i32 = arith.constant 0 : i32
    %c0_i32_0 = arith.constant 0 : i32
    %c0_i32_1 = arith.constant 0 : i32
    return %c0_i32, %c0_i32_0 : i32, i32
  }
  func.func @transform_6(%arg0: i32) -> (i32, i32) {
    %c0_i32 = arith.constant 0 : i32
    %c0_i32_0 = arith.constant 0 : i32
    return %arg0, %c0_i32 : i32, i32
  }
}

</mosaic_0001>

<bundles_post_ra>
// kernel: tpu_custom_call.1
= control target key start
LH: loop header
LB: loop body
LE: loop exit
PB: predicated region body
PF: predicated region fallthrough
CT: control target
= control target key end

     0   :  { %11 = vsyncpa [#allocation3], 0  ;;  %s1962_s0 = inlined_call_operand.vmem [shape: f32[16,32], index: 0, kind: input, shape index: {}]   ;;  %s1963_s1 = inlined_call_operand.vmem [shape: bf16[32,96], index: 1, kind: input, shape index: {}]   ;;  %s1964_s2 = inlined_call_operand.vmem [shape: bf16[4,8,32], index: 2, kind: input, shape index: {}]   ;;  %s1965_s3 = inlined_call_operand.hbm [shape: bf16[32,64], index: 3, kind: input, shape index: {}]   ;;  %s1966_s4 = inlined_call_operand.vmem [shape: bf16[64,32], index: 4, kind: input, shape index: {}]   ;;  %s1967_s5 = inlined_call_operand.vmem [shape: f32[8,128], index: 5, kind: input, shape index: {}]   ;;  %s1968_s6 = inlined_call_operand.hbm [shape: f32[16,32], index: 6, kind: output, shape index: {}]  }
   0x1   :  { %12 = vsyncpa [#allocation4], 0 }
   0x2   :  { %14 = vsyncpa [#allocation4 + $0x1], 0  ;;  %s1663_s21 = smov 0   ;;  %s1665_s22 = smov 0  }
   0x3   :  { %s1667_s23 = smov 0   ;;  %s1669_s24 = smov 0  }
   0x4 LB: > { %s1684_s25 = sadd.s32 4294967295, %s1609_s24   ;;  %s1252_s26 = sadd.s32 4294967294, %s1609_s24   ;;  %s1609_s24 = sphi %s1669_s24, %s1984_s24   ;;  %s1605_s23 = sphi %s1667_s23, %s1983_s23   ;;  %s1601_s22 = sphi %s1665_s22, %s1982_s22   ;;  %s1597_s21 = sphi %s1663_s21, %s1981_s21  }
   0x5   : > { %s1688_s27 = sadd.s32 1, %s1609_s24   ;;  %s158_s28 = sadd.s32 1, %s1605_s23 }
   0x6   : > { %s155_s29 = ssub.s32 %s1609_s24, %s1688_s27  ;;  %p168_p0 = scmp.ne.s32.totalorder %s1605_s23, %s1601_s22 }
   0x7   : > { %p156_p1 = scmp.eq.s32.totalorder %s155_s29, 0  ;;  %p169_p2 = scmp.eq.s32.totalorder %s1684_s25, 1 }
   0x8   : > { %p174_p3 = scmp.ne.s32.totalorder %s1601_s22, %s1597_s21  ;;  %p175_p4 = scmp.eq.s32.totalorder %s1252_s26, 1 }
   0x9   : > { %s1699_s30 = scalar_select %p156_p1, %s1605_s23, %s158_s28  }
   0xa   : > { %p1701_p5 = por %p169_p2, %p168_p0  ;;  %p1705_p6 = por %p175_p4, %p174_p3 }
   0xb   : > { %p1253_p7 = scmp.ge.s32.totalorder %s1609_s24, 1  ;;  %p182_p8 = scmp.lt.s32.totalorder %s1609_s24, 3 }
   0xc   : > { %s1972_s7 = scalar_select %p1701_p5, 1, 0 }
   0xd   : > { %s1973_s8 = scalar_select %p1705_p6, 1, 0 }
   0xe   : > { %p1969_p9 = scmp.eq.s32.totalorder %s1684_s25, 0  ;;  %p1712_p10 = pnand %p1253_p7, %p182_p8 }
   0xf   : > { %s1611_s10 = smov [#allocation2]   ;;  %s1515_s15 = scalar_lea.hbm %s1965_s3, 256 }
  0x10   : > { %s1974_s9 = scalar_select %p1712_p10, 1, 0 }
  0x11   : > { %s200_s11 = sshll.u32 %s1611_s10, 4  ;;  %p1428_p11 = pneg %p1712_p10  ;;  %s201_s11 = int_to_ptr.vmem [resolvable:$true] %s200_s11 }
  0x12   : > { %p1516_p13 = scmp.ne.s32.totalorder %s1965_s3, %s1515_s15  ;;  %p1522_p3 = scmp.lt.u32.totalorder %s1515_s15, %s1965_s3 }
  0x13   : > { %p1720_p12 = pnand %p1969_p9, %p1428_p11 }
  0x15   : > { %p1517_p0 = pneg %p1720_p12 }
  0x17   : > { %p1518_p1 = pnand %p1517_p0, %p1516_p13 }
  0x19   : > { %p1519_p2 = pneg %p1518_p1 }
  0x1b   : > { %p1524_p4 = pnand %p1522_p3, %p1519_p2 }
  0x1d   : > { %1527 = shalt.err (!%p1524_p4)
}
  0x1e   : > { %s1528_s20 = scalar_lea.vmem %s201_s11, 256  ;;  %p1536_p9 = scmp.lt.s32.totalorder %s201_s11, %s201_s11 }
  0x1f   : > { %p1529_p7 = scmp.ne.s32.totalorder %s201_s11, %s1528_s20  ;;  %p1537_p6 = scmp.lt.s32.totalorder %s1528_s20, %s1528_s20 }
  0x21   : > { %p1531_p8 = pnand %p1529_p7, %p1517_p0  ;;  %p1538_p5 = por %p1537_p6, %p1536_p9 }
  0x23   : > { %p1532_p11 = pneg %p1531_p8 }
  0x25   : > { %p1539_p10 = pnand %p1538_p5, %p1532_p11 }
  0x27   : > { %1542 = shalt.err (!%p1539_p10)
}
  0x28   : > { %s1612_s26 = smov 64   ;;  %s1613_s28 = smov 4  }
  0x29   : > { %1431 = dma.hbm_to_vmem [thread:$0]  (!%p1720_p12), %s1965_s3, 256, %s201_s11, [#allocation3], %s1612_s26, %s1612_s26, %s1613_s28  }
  0x2a   : > { %p1976_p13 = scmp.ne.s32.totalorder %s1974_s9, 0 }
  0x2b   : > { %p1977_p1 = scmp.eq.s32.totalorder (!%p1976_p13), %s1684_s25, 0 }
  0x2c   : > { %229 = sbr.rel (%p1976_p13) target bundleno = 3267 (0xcc3), region = 44 }
  0x33   : > { %1588 = dma.done.wait (%p1977_p1), [#allocation3], 256   ;;  %p1978_p0 = pmov %p1977_p1 }
  0x34   : > { %p258_p5 = scmp.lt.s32.totalorder %s1684_s25, 1  ;;  %v1614_v0 = vmov 0.0   ;;  %vm1615_vm0 = vmmov 0   ;;  %v1487_v1 = vld [vmem:[%s1963_s1] sm:$0xff]   ;;  %v1488_v2 = vld [vmem:[%s1963_s1 + $0x8] sm:$0xff]   ;;  %vm302_vm1 = vcmask 261120   ;;  %v286_v5 = vlaneseq }
  0x35   : > { %1590 = vsyncadd (%p1978_p0), [#allocation3], 4294967040  ;;  %1322 = vmatprep.subr.bf16.mxu1 %v1614_v0  ;;  %1326 = vmatprep.mubr.msk.bf16.mxu1 %vm1615_vm0, %v1614_v0  ;;  %v1778_v8 = vld [vmem:[%s1967_s5] sm:$0xff]  ;;  %s1616_s26 = smov 120   ;;  %s1617_s28 = smov 96   ;;  %vm350_vm2 = vcmask 64512  }
  0x36   : > { %s259_s11 = scalar_select %p258_p5, %s1684_s25, 1  ;;  %1336 = vmatprep.subr.bf16.mxu0 %v1614_v0  ;;  %1338 = vmatprep.mubr.msk.bf16.mxu0 %vm1615_vm0, %v1614_v0  ;;  %v1772_v6 = vshrl.u32 %v286_v5, 7  ;;  %vm412_vm3 = vcmask 1043456   ;;  %v269_v47 = vld [vmem:[%s1964_s2] sm:$0xf]  ;;  %vm1098_vm4 = vcmask 523264  }
  0x37   : > { %1323 = vmatpush3.bf16.msra.mxu1 %v1487_v1  ;;  %s1618_s29 = smov 88   ;;  %s1619_s10 = smov 56   ;;  %v620_v48 = vsel %vm412_vm3, %v269_v47, 0  ;;  %v270_v49 = vld [vmem:[%s1964_s2 + $0x4] sm:$0xf] }
  0x38   : > { %s1259_s9 = sshll.u32 %s259_s11, 3  ;;  %1324 = vmatprep.subr.bf16.mxu1 %v1614_v0  ;;  %v288_v7 = vsub.s32 0, %v1772_v6  ;;  %s1620_s11 = smov 64   ;;  %v574_v50 = vsel %vm412_vm3, %v270_v49, 0 }
  0x39   : > { %s261_s14 = scalar_lea.vmem %s1962_s0, %s1259_s9  ;;  %s1621_s9 = smov 80  }
  0x3a   : > { %v1763_v3 = vld [vmem:[%s261_s14] sm:$0xff]  ;;  %v289_v9 = vrot.slane %v1778_v8, %v288_v7  ;;  %s1622_s12 = smov 112   ;;  %s1623_s13 = smov 72  }
  0x3b   : > { %v264_v4 = vpack.c.bf16 %v1763_v3, %v1763_v3  ;;  %1325 = vmatpush3.bf16.msra.mxu1 %v1488_v2  ;;  %s1624_s18 = smov 48   ;;  %s1625_s19 = smov 104  }
  0x3c   : > { %1330 = vmatprep.subr.bf16.mxu1 %v1614_v0  ;;  %s1284_s20 = sshll.u32 %s1684_s25, 7  ;;  %p1979_p9 = scmp.ne.s32.totalorder %s1972_s7, 0 }
  0x3d   : > { %s1627_s25 = smov [#allocation5]  }
  0x3e   : > { %1327 = vmatmul.mubr.msk.bf16.vlgmr.msra.gmra.mrb[0].mxu1 %vm302_vm1, %v264_v4 }
  0x3f   : > { %1332 = vmatprep.mubr.msk.bf16.mxu1 %vm1615_vm0, %v1614_v0 }
 0x111   : > { %v340_v10 = vpop.f32.mrb[0].mxu1 }
 0x112   : > { %v341_v11 = vadd.f32 %v340_v10, %v289_v9  ;;  %v1328_v12 = vpop.f32.mrb[1].mxu1 }
 0x113   : > { %v343_v13 = vpop.f32.mrb[2].mxu1 }
 0x114   : > { %v1781_v14 = vpack.c.bf16 %v341_v11, %v341_v11  ;;  %v1329_v15 = vpop.f32.mrb[3].mxu1 }
 0x116   : > { %459 = vrot.lane.b32.xlu1 %v1781_v14, %s1616_s26  ;;  %348 = vrot.lane.b32.xlu0 %v1781_v14, %s1617_s28  ;;  %s1626_s28 = smov 40  }
 0x11a   : > { %461 = vrot.lane.b32.xlu0 %v1781_v14, %s1618_s29 }
 0x188   : > { %v349_v16 = vpop.permute.xlu0 %348  ;;  %v460_v20 = vpop.permute.xlu1 %459 }
 0x189   : > { %v355_v17 = vsel %vm350_vm2, %v349_v16, 0 }
 0x18a   : > { %1331 = vmatpush3.bf16.xpose.msra.mxu1 %v355_v17 }
 0x18b   : > { %1342 = vmatprep.subr.bf16.mxu1 %v1614_v0 }
 0x18c   : > { %v462_v18 = vpop.permute.xlu0 %461 }
 0x18d   : > { %v467_v19 = vsel %vm350_vm2, %v462_v18, 0 }
 0x191   : > { %1333 = vmatmul.mubr.msk.bf16.vlgmr.msra.gmra.mrb[4].mxu1 %vm350_vm2, %v1781_v14 }
 0x192   : > { %1343 = vmatpush3.bf16.xpose.msra.mxu1 %v467_v19  ;;  %1344 = vmatprep.mubr.msk.bf16.mxu1 %vm1615_vm0, %v1614_v0 }
 0x193   : > { %1354 = vmatprep.subr.bf16.mxu1 %v1614_v0 }
 0x199   : > { %1345 = vmatmul.mubr.msk.bf16.vlgmr.msra.gmra.mrb[8].mxu1 %vm350_vm2, %v460_v20 }
 0x19a   : > { %1356 = vmatprep.mubr.msk.bf16.mxu1 %vm1615_vm0, %v1614_v0  ;;  %1355 = vmatpush3.bf16.msra.mxu1 %v574_v50 }
 0x19b   : > { %1366 = vmatprep.subr.bf16.mxu1 %v1614_v0 }
 0x264   : > { %v391_v21 = vpop.f32.mrb[4].mxu1 }
 0x265   : > { %v1334_v22 = vpop.f32.mrb[5].mxu1  ;;  %v397_v23 = vsel %vm350_vm2, %v391_v21, -inf }
 0x266   : > { %398 = vmax.xlane.f32.xlu1 %v397_v23  ;;  %v394_v24 = vpop.f32.mrb[6].mxu1 }
 0x267   : > { %v1335_v25 = vpop.f32.mrb[7].mxu1 }
 0x26c   : > { %v503_v26 = vpop.f32.mrb[8].mxu1 }
 0x26d   : > { %v1346_v27 = vpop.f32.mrb[9].mxu1  ;;  %v509_v28 = vsel %vm350_vm2, %v503_v26, -inf }
 0x26e   : > { %510 = vmax.xlane.f32.xlu0 %v509_v28  ;;  %v506_v29 = vpop.f32.mrb[10].mxu1 }
 0x26f   : > { %v1347_v30 = vpop.f32.mrb[11].mxu1 }
 0x277   : > { %519 = vrot.lane.b32.xlu1 %v1781_v14, %s1619_s10 }
 0x284   : > { %407 = vrot.lane.b32.xlu0 %v1781_v14, %s1620_s11  ;;  %s1919_s11 = scalar_lea.hbm %s1968_s6, %s1284_s20 }
 0x288   : > { %664 = vrot.lane.b32.xlu0 %v1781_v14, %s1621_s9 }
 0x28c   : > { %662 = vrot.lane.b32.xlu0 %v1781_v14, %s1622_s12 }
 0x2f3   : > { %v399_v31 = vpop.xlane.xlu1 %398 }
 0x2f4   : > { %v400_v32 = vsub.f32 %v391_v21, %v399_v31 }
 0x2f6   : > { %v401_v33 = vmul.f32 1.442695, %v400_v32 }
 0x2f7   : > { %v520_v40 = vpop.permute.xlu1 %519 }
 0x2f8   : > { %1495 = vpow2.f32 %v401_v33  ;;  %v525_v43 = vsel %vm412_vm3, %v520_v40, 0 }
 0x2fb   : > { %v511_v34 = vpop.xlane.xlu0 %510 }
 0x2fc   : > { %v512_v35 = vsub.f32 %v503_v26, %v511_v34 }
 0x2fe   : > { %v513_v36 = vmul.f32 1.442695, %v512_v35 }
 0x2ff   : > { %v408_v37 = vpop.permute.xlu0 %407 }
 0x300   : > { %1497 = vpow2.f32 %v513_v36  ;;  %v414_v38 = vsel %vm412_vm3, %v408_v37, 0  ;;  %v271_v36 = vld [vmem:[%s1964_s2 + $0x8] sm:$0xf] }
 0x301   : > { %1337 = vmatpush3.bf16.msra.mxu0 %v414_v38  ;;  %v777_v37 = vsel %vm412_vm3, %v271_v36, 0  ;;  %v1005_v36 = vsub.s32 3, %v1772_v6 }
 0x302   : > { %v1496_v39 = vpop.eup %1495  ;;  %1348 = vmatprep.subr.bf16.mxu0 %v1614_v0 }
 0x303   : > { %v403_v41 = vsel %vm350_vm2, %v1496_v39, 0.0  ;;  %v406_v42 = vpack.c.bf16 %v1496_v39, %v1496_v39  ;;  %v665_v51 = vpop.permute.xlu0 %664 }
 0x304   : > { %404 = vadd.xlane.f32.xlu0 %v403_v41  ;;  %v670_v9 = vsel %vm350_vm2, %v665_v51, 0 }
 0x305   : > { %1339 = vmatmul.mubr.msk.bf16.vlgmr.msra.gmra.mrb[0].mxu0 %vm350_vm2, %v406_v42 }
 0x306   : > { %1349 = vmatpush3.bf16.msra.mxu0 %v525_v43  ;;  %1350 = vmatprep.mubr.msk.bf16.mxu0 %vm1615_vm0, %v1614_v0 }
 0x307   : > { %1360 = vmatprep.subr.bf16.mxu0 %v1614_v0  ;;  %v663_v52 = vpop.permute.xlu0 %662 }
 0x30a   : > { %v1498_v44 = vpop.eup %1497 }
 0x30b   : > { %v515_v45 = vsel %vm350_vm2, %v1498_v44, 0.0  ;;  %v518_v46 = vpack.c.bf16 %v1498_v44, %v1498_v44 }
 0x30c   : > { %516 = vadd.xlane.f32.xlu1 %v515_v45 }
 0x30d   : > { %1351 = vmatmul.mubr.msk.bf16.vlgmr.msra.gmra.mrb[4].mxu0 %vm350_vm2, %v518_v46 }
 0x30e   : > { %1362 = vmatprep.mubr.msk.bf16.mxu0 %vm1615_vm0, %v1614_v0  ;;  %1361 = vmatpush3.bf16.msra.mxu0 %v620_v48 }
 0x30f   : > { %1372 = vmatprep.subr.bf16.mxu0 %v1614_v0 }
 0x31a   : > { %822 = vrot.lane.b32.xlu0 %v1781_v14, %s1623_s13  ;;  %s1547_s13 = sshll.u32 %s1627_s25, 4  ;;  %s1548_s13 = int_to_ptr.vmem [resolvable:$false] %s1547_s13 }
 0x31b   : > { %s1549_s14 = scalar_lea.vmem %s1548_s13, 256 }
 0x391   : > { %v405_v53 = vpop.xlane.xlu0 %404 }
 0x392   : > { %1499 = vrcp.f32 %v405_v53 }
 0x395   : > { %v823_v31 = vpop.permute.xlu0 %822 }
 0x396   : > { %v828_v34 = vsel %vm350_vm2, %v823_v31, 0  ;;  %v1492_v31 = vld [vmem:[%s1966_s4 + $0x8] sm:$0xff]  }
 0x399   : > { %v517_v54 = vpop.xlane.xlu1 %516 }
 0x39a   : > { %1501 = vrcp.f32 %v517_v54 }
 0x39c   : > { %v1500_v55 = vpop.eup %1499 }
 0x3a4   : > { %v1502_v62 = vpop.eup %1501 }
 0x3d8   : > { %v450_v56 = vpop.f32.mrb[0].mxu0 }
 0x3d9   : > { %v457_v57 = vmul.f32 %v1500_v55, %v450_v56  ;;  %v1340_v58 = vpop.f32.mrb[1].mxu0 }
 0x3da   : > { %v453_v59 = vpop.f32.mrb[2].mxu0 }
 0x3db   : > { %v458_v60 = vpack.c.bf16 %v457_v57, %v457_v57  ;;  %v1341_v61 = vpop.f32.mrb[3].mxu0 }
 0x3dd   : > { %1363 = vmatmul.mubr.msk.bf16.vlgmr.msra.gmra.mrb[8].mxu0 %vm350_vm2, %v458_v60 }
 0x3de   : > { %1374 = vmatprep.mubr.msk.bf16.mxu0 %vm1615_vm0, %v1614_v0 }
 0x3e0   : > { %v561_v63 = vpop.f32.mrb[4].mxu0 }
 0x3e1   : > { %v568_v1 = vmul.f32 %v1502_v62, %v561_v63  ;;  %v1352_v2 = vpop.f32.mrb[5].mxu0 }
 0x3e2   : > { %v564_v4 = vpop.f32.mrb[6].mxu0 }
 0x3e3   : > { %v569_v5 = vpack.c.bf16 %v568_v1, %v568_v1  ;;  %v1353_v7 = vpop.f32.mrb[7].mxu0 }
 0x3e5   : > { %1357 = vmatmul.mubr.msk.bf16.vlgmr.msra.gmra.mrb[12].mxu1 %vm350_vm2, %v569_v5 }
 0x3e6   : > { %1367 = vmatpush3.bf16.xpose.msra.mxu1 %v670_v9  ;;  %1368 = vmatprep.mubr.msk.bf16.mxu1 %vm1615_vm0, %v1614_v0 }
 0x3e7   : > { %1378 = vmatprep.subr.bf16.mxu1 %v1614_v0 }
 0x3ed   : > { %1369 = vmatmul.mubr.msk.bf16.vlgmr.msra.gmra.mrb[16].mxu1 %vm350_vm2, %v663_v52 }
 0x3ee   : > { %1380 = vmatprep.mubr.msk.bf16.mxu1 %vm1615_vm0, %v1614_v0  ;;  %1379 = vmatpush3.bf16.msra.mxu1 %v777_v37 }
 0x3ef   : > { %1390 = vmatprep.subr.bf16.mxu1 %v1614_v0 }
 0x4b0   : > { %v656_v10 = vpop.f32.mrb[8].mxu0 }
 0x4b1   : > { %v1364_v11 = vpop.f32.mrb[9].mxu0 }
 0x4b2   : > { %v659_v12 = vpop.f32.mrb[10].mxu0 }
 0x4b3   : > { %v1365_v13 = vpop.f32.mrb[11].mxu0 }
 0x4b4   : > { %v980_v13 = vsub.s32 1, %v1772_v6 }
 0x4b8   : > { %v610_v15 = vpop.f32.mrb[12].mxu1 }
 0x4b9   : > { %v1837_v16 = vadd.f32 %v656_v10, %v610_v15  ;;  %v1358_v17 = vpop.f32.mrb[13].mxu1  ;;  %v981_v15 = vrot.slane %v1778_v8, %v980_v13 }
 0x4ba   : > { %v613_v18 = vpop.f32.mrb[14].mxu1 }
 0x4bb   : > { %v1359_v19 = vpop.f32.mrb[15].mxu1 }
 0x4c0   : > { %v706_v20 = vpop.f32.mrb[16].mxu1 }
 0x4c1   : > { %v1370_v21 = vpop.f32.mrb[17].mxu1  ;;  %v712_v22 = vsel %vm350_vm2, %v706_v20, -inf }
 0x4c2   : > { %713 = vmax.xlane.f32.xlu1 %v712_v22  ;;  %v709_v23 = vpop.f32.mrb[18].mxu1 }
 0x4c3   : > { %v1371_v24 = vpop.f32.mrb[19].mxu1 }
 0x4d3   : > { %722 = vrot.lane.b32.xlu1 %v1781_v14, %s1624_s18  ;;  %s255_s18 = sand.u32 1, %s1601_s22  }
 0x4d4   : > { %s1168_s9 = scalar_lea.sflag [#allocation4], %s255_s18 }
 0x4d7   : > { %820 = vrot.lane.b32.xlu1 %v1781_v14, %s1625_s19  ;;  %s1258_s19 = sshll.u32 %s255_s18, 3 }
 0x4d8   : > { %s257_s26 = scalar_lea.vmem [#allocation5], %s1258_s19 }
 0x54f   : > { %v714_v25 = vpop.xlane.xlu1 %713 }
 0x550   : > { %v715_v26 = vsub.f32 %v706_v20, %v714_v25 }
 0x552   : > { %v716_v27 = vmul.f32 1.442695, %v715_v26 }
 0x553   : > { %v723_v28 = vpop.permute.xlu1 %722 }
 0x554   : > { %1503 = vpow2.f32 %v716_v27  ;;  %v728_v29 = vsel %vm412_vm3, %v723_v28, 0 }
 0x555   : > { %1373 = vmatpush3.bf16.msra.mxu0 %v728_v29  ;;  %v1489_v29 = vld [vmem:[#allocation2] sm:$0xff]  }
 0x556   : > { %1384 = vmatprep.subr.bf16.mxu0 %v1614_v0 }
 0x557   : > { %v821_v35 = vpop.permute.xlu1 %820 }
 0x55e   : > { %v1504_v30 = vpop.eup %1503 }
 0x55f   : > { %v718_v32 = vsel %vm350_vm2, %v1504_v30, 0.0  ;;  %v721_v33 = vpack.c.bf16 %v1504_v30, %v1504_v30  ;;  %v1490_v30 = vld [vmem:[#allocation2 + $0x8] sm:$0xff]  }
 0x560   : > { %719 = vadd.xlane.f32.xlu1 %v718_v32 }
 0x561   : > { %1375 = vmatmul.mubr.msk.bf16.vlgmr.msra.gmra.mrb[12].mxu0 %vm350_vm2, %v721_v33 }
 0x562   : > { %1385 = vmatpush3.bf16.xpose.msra.mxu0 %v828_v34  ;;  %1386 = vmatprep.mubr.msk.bf16.mxu0 %vm1615_vm0, %v1614_v0 }
 0x563   : > { %1396 = vmatprep.subr.bf16.mxu0 %v1614_v0 }
 0x569   : > { %1387 = vmatmul.mubr.msk.bf16.vlgmr.msra.gmra.mrb[16].mxu0 %vm350_vm2, %v821_v35  ;;  %v1000_v35 = vsub.s32 2, %v1772_v6 }
 0x56a   : > { %1398 = vmatprep.mubr.msk.bf16.mxu0 %vm1615_vm0, %v1614_v0 }
 0x56b   : > { %v1001_v37 = vrot.slane %v1778_v8, %v1000_v35 }
 0x5ed   : > { %v720_v38 = vpop.xlane.xlu1 %719 }
 0x5ee   : > { %1505 = vrcp.f32 %v720_v38 }
 0x5f8   : > { %v1506_v39 = vpop.eup %1505 }
 0x634   : > { %v764_v40 = vpop.f32.mrb[12].mxu0 }
 0x635   : > { %v771_v41 = vmul.f32 %v1506_v39, %v764_v40  ;;  %v1376_v42 = vpop.f32.mrb[13].mxu0  ;;  %v1006_v40 = vrot.slane %v1778_v8, %v1005_v36 }
 0x636   : > { %v767_v43 = vpop.f32.mrb[14].mxu0 }
 0x637   : > { %v772_v44 = vpack.c.bf16 %v771_v41, %v771_v41  ;;  %v1377_v45 = vpop.f32.mrb[15].mxu0 }
 0x638   : > { %v1494_v45 = vld [vmem:[%s1966_s4 + $0x18] sm:$0xff]  }
 0x639   : > { %1381 = vmatmul.mubr.msk.bf16.vlgmr.msra.gmra.mrb[20].mxu1 %vm350_vm2, %v772_v44  ;;  %v1493_v44 = vld [vmem:[%s1966_s4 + $0x10] sm:$0xff]  }
 0x63a   : > { %1392 = vmatprep.mubr.msk.bf16.mxu1 %vm1615_vm0, %v1614_v0 }
 0x63c   : > { %v864_v46 = vpop.f32.mrb[16].mxu0 }
 0x63d   : > { %v1388_v47 = vpop.f32.mrb[17].mxu0  ;;  %v870_v48 = vsel %vm350_vm2, %v864_v46, -inf }
 0x63e   : > { %871 = vmax.xlane.f32.xlu0 %v870_v48  ;;  %v867_v49 = vpop.f32.mrb[18].mxu0 }
 0x63f   : > { %v1389_v50 = vpop.f32.mrb[19].mxu0 }
 0x654   : > { %880 = vrot.lane.b32.xlu0 %v1781_v14, %s1626_s28  ;;  %v272_v14 = vld [vmem:[%s1964_s2 + $0xc] sm:$0xf]  ;;  %s1181_s28 = sshll.u32 %s257_s26, 4  ;;  %s1921_s28 = int_to_ptr.vmem [resolvable:$true] %s1181_s28 }
 0x655   : > { %v935_v59 = vsel %vm412_vm3, %v272_v14, 0  ;;  %s1543_s12 = scalar_lea.vmem %s1921_s28, 128  ;;  %p1550_p2 = scmp.lt.s32.totalorder %s1921_s28, %s1548_s13 }
 0x656   : > { %1397 = vmatpush3.bf16.msra.mxu0 %v935_v59  ;;  %p1544_p6 = scmp.ne.s32.totalorder %s1921_s28, %s1543_s12  ;;  %p1551_p3 = scmp.lt.s32.totalorder %s1549_s14, %s1543_s12 }
 0x657   : > { %1410 = vmatprep.subr.bf16.mxu0 %v1614_v0 }
 0x658   : > { %p1545_p10 = pnand %p1544_p6, %p1979_p9  ;;  %p1552_p4 = por %p1551_p3, %p1550_p2 }
 0x65a   : > { %p1546_p12 = pneg %p1545_p10 }
 0x65c   : > { %p1553_p7 = pnand %p1552_p4, %p1546_p12 }
 0x6cb   : > { %v872_v51 = vpop.xlane.xlu0 %871 }
 0x6cc   : > { %v873_v52 = vsub.f32 %v864_v46, %v872_v51  ;;  %v1011_v46 = vsub.s32 4, %v1772_v6 }
 0x6ce   : > { %v874_v53 = vmul.f32 1.442695, %v873_v52  ;;  %v1012_v47 = vrot.slane %v1778_v8, %v1011_v46 }
 0x6cf   : > { %v881_v54 = vpop.permute.xlu0 %880 }
 0x6d0   : > { %1507 = vpow2.f32 %v874_v53  ;;  %v886_v55 = vsel %vm412_vm3, %v881_v54, 0 }
 0x6d1   : > { %1391 = vmatpush3.bf16.msra.mxu1 %v886_v55 }
 0x6d2   : > { %1402 = vmatprep.subr.bf16.mxu1 %v1614_v0 }
 0x6da   : > { %v1508_v56 = vpop.eup %1507 }
 0x6db   : > { %v876_v57 = vsel %vm350_vm2, %v1508_v56, 0.0  ;;  %v879_v58 = vpack.c.bf16 %v1508_v56, %v1508_v56 }
 0x6dc   : > { %877 = vadd.xlane.f32.xlu1 %v876_v57 }
 0x6dd   : > { %1393 = vmatmul.mubr.msk.bf16.vlgmr.msra.gmra.mrb[24].mxu1 %vm350_vm2, %v879_v58 }
 0x6de   : > { %1406 = vmatprep.mubr.msk.bf16.mxu1 %vm1615_vm0, %v1614_v0  ;;  %1403 = vmatpush3.bf16.msra.mxu1 %v1489_v29 }
 0x6df   : > { %1404 = vmatprep.subr.bf16.mxu1 %v1614_v0 }
 0x6e2   : > { %1405 = vmatpush3.bf16.msra.mxu1 %v1490_v30 }
 0x70c   : > { %v813_v60 = vpop.f32.mrb[20].mxu1 }
 0x70d   : > { %v819_v61 = vadd.f32 %v813_v60, %v1837_v16  ;;  %v1382_v62 = vpop.f32.mrb[21].mxu1 }
 0x70e   : > { %v816_v63 = vpop.f32.mrb[22].mxu1 }
 0x70f   : > { %v1383_v1 = vpop.f32.mrb[23].mxu1 }
 0x769   : > { %v878_v2 = vpop.xlane.xlu1 %877 }
 0x76a   : > { %1509 = vrcp.f32 %v878_v2 }
 0x774   : > { %v1510_v4 = vpop.eup %1509 }
 0x7b0   : > { %v922_v5 = vpop.f32.mrb[24].mxu1 }
 0x7b1   : > { %v929_v7 = vmul.f32 %v1510_v4, %v922_v5  ;;  %v1394_v9 = vpop.f32.mrb[25].mxu1 }
 0x7b2   : > { %v925_v10 = vpop.f32.mrb[26].mxu1 }
 0x7b3   : > { %v930_v11 = vpack.c.bf16 %v929_v7, %v929_v7  ;;  %v1395_v12 = vpop.f32.mrb[27].mxu1  ;;  %v1158_v10 = vsub.s32 6, %v1772_v6 }
 0x7b5   : > { %1399 = vmatmul.mubr.msk.bf16.vlgmr.msra.gmra.mrb[20].mxu0 %vm350_vm2, %v930_v11  ;;  %v1163_v11 = vsub.s32 7, %v1772_v6  ;;  %v1159_v12 = vrot.slane %v1778_v8, %v1158_v10 }
 0x7b6   : > { %1418 = vmatprep.mubr.msk.bf16.mxu0 %vm1615_vm0, %v1614_v0 }
 0x888   : > { %v971_v16 = vpop.f32.mrb[20].mxu0 }
 0x889   : > { %v977_v17 = vadd.f32 %v971_v16, %v819_v61  ;;  %v1400_v18 = vpop.f32.mrb[21].mxu0  ;;  %v1164_v16 = vrot.slane %v1778_v8, %v1163_v11 }
 0x88a   : > { %v974_v19 = vpop.f32.mrb[22].mxu0 }
 0x88b   : > { %v982_v20 = vadd.f32 %v981_v15, %v977_v17  ;;  %v1401_v21 = vpop.f32.mrb[23].mxu0 }
 0x88d   : > { %v983_v22 = vadd.f32 %v982_v20, %v1763_v3  ;;  %v1491_v3 = vld [vmem:[%s1966_s4] sm:$0xff]  }
 0x88e   : > { %1411 = vmatpush3.bf16.msra.mxu0 %v1491_v3 }
 0x88f   : > { %v984_v23 = vsel %vm302_vm1, %v983_v22, 0.0  ;;  %1412 = vmatprep.subr.bf16.mxu0 %v1614_v0 }
 0x890   : > { %985 = vadd.xlane.f32.xlu1 %v984_v23 }
 0x892   : > { %1413 = vmatpush3.bf16.msra.mxu0 %v1492_v31 }
 0x893   : > { %1414 = vmatprep.subr.bf16.mxu0 %v1614_v0 }
 0x896   : > { %1415 = vmatpush3.bf16.msra.mxu0 %v1493_v44 }
 0x897   : > { %1416 = vmatprep.subr.bf16.mxu0 %v1614_v0  ;;  %v1072_v0 = vsub.s32 5, %v1772_v6 }
 0x899   : > { %v1073_v55 = vrot.slane %v1778_v8, %v1072_v0 }
 0x89a   : > { %1417 = vmatpush3.bf16.msra.mxu0 %v1494_v45 }
 0x91d   : > { %v986_v24 = vpop.xlane.xlu1 %985 }
 0x91e   : > { %v988_v25 = vmul.f32 0.03125, %v986_v24 }
 0x920   : > { %v989_v26 = vsub.f32 %v983_v22, %v988_v25 }
 0x922   : > { %v990_v27 = vmul.f32 %v989_v26, %v989_v26 }
 0x924   : > { %v991_v28 = vsel %vm302_vm1, %v990_v27, 0.0 }
 0x925   : > { %992 = vadd.xlane.f32.xlu1 %v991_v28 }
 0x9b2   : > { %v993_v32 = vpop.xlane.xlu1 %992 }
 0x9b3   : > { %v994_v33 = vmul.f32 0.03125, %v993_v32 }
 0x9b5   : > { %v995_v34 = vadd.f32 1e-05, %v994_v33 }
 0x9b7   : > { %1511 = vrsqrt.f32 %v995_v34 }
 0x9c1   : > { %v1512_v38 = vpop.eup %1511 }
 0x9c2   : > { %v997_v39 = vmul.f32 %v1512_v38, %v989_v26 }
 0x9c4   : > { %v1002_v41 = vmul.f32 %v1001_v37, %v997_v39 }
 0x9c6   : > { %v1007_v42 = vadd.f32 %v1006_v40, %v1002_v41 }
 0x9c8   : > { %v1008_v43 = vpack.c.bf16 %v1007_v42, %v1007_v42 }
 0x9ca   : > { %1407 = vmatmul.mubr.msk.bf16.vlgmr.msra.gmra.mrb[28].mxu1 %vm302_vm1, %v1008_v43 }
 0xa9d   : > { %v1062_v48 = vpop.f32.mrb[28].mxu1 }
 0xa9e   : > { %v1063_v49 = vadd.f32 %v1062_v48, %v1012_v47  ;;  %v1408_v50 = vpop.f32.mrb[29].mxu1 }
 0xa9f   : > { %v1065_v51 = vpop.f32.mrb[30].mxu1 }
 0xaa0   : > { %v1068_v52 = vmax.f32 %v1063_v49, 0.0  ;;  %v1409_v53 = vpop.f32.mrb[31].mxu1 }
 0xaa2   : > { %v1069_v54 = vpack.c.bf16 %v1068_v52, %v1068_v52 }
 0xaa4   : > { %1419 = vmatmul.mubr.msk.bf16.vlgmr.msra.gmra.mrb[24].mxu0 %vm1098_vm4, %v1069_v54 }
 0xb77   : > { %v1136_v56 = vpop.f32.mrb[24].mxu0 }
 0xb78   : > { %v1137_v57 = vadd.f32 %v1136_v56, %v1073_v55  ;;  %v1420_v58 = vpop.f32.mrb[25].mxu0 }
 0xb79   : > { %v1139_v14 = vpop.f32.mrb[26].mxu0 }
 0xb7a   : > { %v1421_v59 = vpop.f32.mrb[27].mxu0  ;;  %v1142_v60 = vadd.f32 %v1137_v57, %v1007_v42 }
 0xb7c   : > { %v1143_v61 = vsel %vm302_vm1, %v1142_v60, 0.0 }
 0xb7d   : > { %1144 = vadd.xlane.f32.xlu1 %v1143_v61 }
 0xc0a   : > { %v1145_v62 = vpop.xlane.xlu1 %1144 }
 0xc0b   : > { %v1146_v63 = vmul.f32 0.03125, %v1145_v62 }
 0xc0d   : > { %v1147_v1 = vsub.f32 %v1142_v60, %v1146_v63 }
 0xc0f   : > { %v1148_v2 = vmul.f32 %v1147_v1, %v1147_v1 }
 0xc11   : > { %v1149_v4 = vsel %vm302_vm1, %v1148_v2, 0.0 }
 0xc12   : > { %1150 = vadd.xlane.f32.xlu1 %v1149_v4 }
 0xc9f   : > { %v1151_v5 = vpop.xlane.xlu1 %1150 }
 0xca0   : > { %v1152_v7 = vmul.f32 0.03125, %v1151_v5 }
 0xca2   : > { %v1153_v9 = vadd.f32 1e-05, %v1152_v7 }
 0xca4   : > { %1513 = vrsqrt.f32 %v1153_v9 }
 0xcae   : > { %v1514_v13 = vpop.eup %1513 }
 0xcaf   : > { %v1155_v15 = vmul.f32 %v1514_v13, %v1147_v1 }
 0xcb1   : > { %v1160_v17 = vmul.f32 %v1159_v12, %v1155_v15 }
 0xcb3   : > { %v1165_v18 = vadd.f32 %v1164_v16, %v1160_v17 }
 0xcb5   : > { %1166 = vst.msk [vmem:[%s257_s26] sm:$0xff] %vm302_vm1, %v1165_v18 }
 0xcb6   : > { %1556 = shalt.err (!%p1553_p7)
}
 0xcb7   : > { %s1557_s15 = scalar_lea.hbm %s1919_s11, 128  ;;  %s1561_s18 = scalar_lea.hbm %s1968_s6, 256 }
 0xcb8   : > { %p1558_p8 = scmp.ne.s32.totalorder %s1919_s11, %s1557_s15  ;;  %p1562_p1 = scmp.lt.u32.totalorder %s1919_s11, %s1968_s6 }
 0xcb9   : > { %p1563_p0 = scmp.lt.u32.totalorder %s1561_s18, %s1557_s15  ;;  %p1565_p6 = scmp.lt.u32.totalorder %s1557_s15, %s1919_s11 }
 0xcba   : > { %p1559_p11 = pnand %p1558_p8, %p1979_p9 }
 0xcbb   : > { %p1564_p5 = por %p1563_p0, %p1562_p1 }
 0xcbc   : > { %p1560_p13 = pneg %p1559_p11 }
 0xcbd   : > { %p1566_p10 = por %p1565_p6, %p1564_p5 }
 0xcbf   : > { %p1567_p12 = pnand %p1566_p10, %p1560_p13 }
 0xcc1   : > { %1570 = shalt.err (!%p1567_p12)
}
 0xcc2   : > { %1426 = dma.vmem_to_hbm [thread:$0]  (%p1979_p9), %s1921_s28, 128, %s1919_s11, %s1168_s9  }
 0xcc3 PF: > { %p1438_p2 = scmp.ge.s32.totalorder %s1609_s24, 2  ;;  %s1193_s26 = sand.u32 1, %s1597_s21  }
 0xcc4   : > { %p1980_p3 = scmp.ne.s32.totalorder %s1973_s8, 0  ;;  %s1194_s29 = scalar_lea.sflag [#allocation4], %s1193_s26 }
 0xcc6   : > { %p1433_p4 = pnand %p1438_p2, %p1980_p3 }
 0xcc8   : > { %1592 = dma.done.wait (!%p1433_p4), %s1194_s29, 128  }
 0xcc9   : > { %1594 = vsyncadd (!%p1433_p4), %s1194_s29, 4294967168  ;;  %p17_p7 = scmp.ge.s32.totalorder %s1688_s27, 4   ;;  %s1981_s21 = smov %s1601_s22 }
 0xcca   : > { %s1982_s22 = smov %s1605_s23  ;;  %s1983_s23 = smov %s1699_s30 }
 0xccb   : > { %s1984_s24 = smov %s1688_s27  ;;  %19 = sbr.rel (!%p17_p7) target bundleno = 4 (0x4), region = 84 }
 0xcd2   :  { %1199 = vsyncpa [#allocation3], 1 }
 0xcd3   :  { %1201 = vsyncpa [#allocation3 + $0x1], 1 }
 0xcd4   :  { %1202 = vsyncpa [#allocation4], 1 }
 0xcd5   :  { %1204 = vsyncpa [#allocation4 + $0x1], 1 }

</bundles_post_ra>
